<compile_context>
chip_gen: v5e
topology: v5e:2x2
jax: 0.10.0
libtpu: 0.0.40
codegen_flags: <defaults>
</compile_context>

<pallas_src>
import functools

import jax
import jax.numpy as jnp
from jax.experimental import pallas as pl
from jax.experimental.pallas import tpu as pltpu


def _round_up(a: int, b: int) -> int:
    return (a + b - 1) // b * b


def _divisor_tile(total: int, max_tile: int, quantum: int = 128) -> int:
    """Largest multiple of `quantum` that divides `total` and is <= max_tile
    (never below `quantum`; `total` is assumed to be a multiple of `quantum`)."""
    t = min(total, max(quantum, (max_tile // quantum) * quantum))
    while total % t:
        t -= quantum
    return t


def _vmem_capacity_bytes() -> int:
    try:
        return int(pltpu.get_tpu_info().vmem_capacity_bytes)
    except Exception:
        return 64 << 20  # conservative fallback: v7x per-TensorCore VMEM


def _pick_m_tile(M: int, per_row_bytes: int, tile_budget: int) -> int:
    """Pick the M tile: fit VMEM, minimize pad waste + per-step overhead,
    prefer an even tile count (v7x 2-TC megacore split)."""
    if M <= 256:
        return _round_up(M, 8)  # toy shapes: single sublane-aligned tile
    fitting = [t for t in (1024, 768, 512, 384, 256, 128, 64, 32, 16, 8)
               if t * per_row_bytes <= tile_budget]
    if not fitting:
        return 8

    def score(t):
        m_pad = _round_up(M, t)
        tiles = m_pad // t
        # padded rows (wasted FLOPs/DMA) + ~0.35us fixed grid-step overhead
        # expressed in row-equivalents; tie-break: even tile count, then larger tile.
        return (m_pad - M) + 16 * tiles, tiles % 2, -t

    return min(fitting, key=score)


def _patch_embed_kernel(p_ref, w_ref, b_ref, o_ref):
    # p_ref: [TM, K_pad] bf16 patch tile; w_ref: [K_pad, TE] bf16 weight tile;
    # b_ref: [1, TE] f32 bias; o_ref: [TM, TE] f32 output tile.
    acc = jnp.dot(p_ref[...], w_ref[...], preferred_element_type=jnp.float32)
    o_ref[...] = (acc + b_ref[...]).astype(o_ref.dtype)


@functools.partial(jax.jit, static_argnames=("patch_size",))
def patch_embedding(x, weight, bias, patch_size):
    """x: [B, C, H, W] (NCHW), weight: [E, C, p, p], bias: [E] -> [B, N_p, E]."""
    B, C, H, W = x.shape
    E = weight.shape[0]
    p = patch_size
    assert H % p == 0 and W % p == 0
    H_p, W_p = H // p, W // p
    N_p = H_p * W_p
    K = C * p * p
    M = B * N_p
    out_dtype = x.dtype

    # Patch extraction (stride == kernel conv <=> reshape/transpose), channel-major
    # (C, p, p) inside each patch to match Conv2d's weight flattening. Materialized
    # by XLA into a contiguous [M, K] slab (no allow_input_fusion; see header).
    patches = x.reshape(B, C, H_p, p, W_p, p)
    patches = jnp.transpose(patches, (0, 2, 4, 1, 3, 5)).reshape(M, K)
    patches = patches.astype(jnp.bfloat16)

    # Conv2d weight [E, C, p, p] flattened in the same (C, p, p) order -> [K, E].
    w_mat = weight.reshape(E, K).T.astype(jnp.bfloat16)
    b_mat = bias.reshape(1, E).astype(jnp.float32)

    # ---- Alignment (lane-dense loads/stores, full MXU tiles) -----------------
    K_pad = _round_up(K, 128)
    E_pad = _round_up(E, 128)

    in_b = 2                                   # bf16 patches
    w_b = 2                                    # bf16 weight
    out_b = jnp.dtype(out_dtype).itemsize      # f32 output
    bias_b = 4                                 # f32 bias

    # ---- Generation-aware VMEM budget & tiling --------------------------------
    vmem_cap = _vmem_capacity_bytes()
    budget = int(vmem_cap * 0.7)

    # Tile E only if the (double-buffered) weight block would eat >half the budget
    # (large-head case on v7x's 64 MiB VMEM); otherwise TE == E_pad, weight resident.
    TE = E_pad
    while TE > 128 and (2 * K_pad * TE * w_b + 2 * TE * bias_b) > budget // 2:
        TE = _divisor_tile(E_pad, TE - 128)

    resident = 2 * K_pad * TE * w_b + 2 * TE * bias_b
    per_row = 2 * K_pad * in_b + 2 * TE * out_b       # double-buffered patch+out rows
    TM = _pick_m_tile(M, per_row, max(budget - resident, per_row * 8))
    M_pad = _round_up(M, TM)

    patches = jnp.pad(patches, ((0, M_pad - M), (0, K_pad - K)))
    w_mat = jnp.pad(w_mat, ((0, K_pad - K), (0, E_pad - E)))
    b_mat = jnp.pad(b_mat, ((0, 0), (0, E_pad - E)))

    used = 2 * TM * K_pad * in_b + 2 * TM * TE * out_b + resident
    vmem_limit = min(max(int(used * 1.5) + (4 << 20), 32 << 20),
                     vmem_cap - (2 << 20))

    cost = pl.CostEstimate(
        flops=2 * M_pad * K_pad * E_pad,
        bytes_accessed=(M_pad * K_pad * in_b + K_pad * E_pad * w_b
                        + E_pad * bias_b + M_pad * E_pad * out_b),
        transcendentals=0,
    )

    out = pl.pallas_call(
        _patch_embed_kernel,
        out_shape=jax.ShapeDtypeStruct((M_pad, E_pad), out_dtype),
        grid_spec=pl.GridSpec(
            grid=(M_pad // TM, E_pad // TE),
            in_specs=[
                pl.BlockSpec((TM, K_pad), lambda i, j: (i, 0)),    # patch tile
                pl.BlockSpec((K_pad, TE), lambda i, j: (0, j)),    # weight tile
                pl.BlockSpec((1, TE), lambda i, j: (0, j)),        # bias tile
            ],
            out_specs=pl.BlockSpec((TM, TE), lambda i, j: (i, j)),
        ),
        compiler_params=pltpu.CompilerParams(
            dimension_semantics=("parallel", "parallel"),  # megacore-friendly
            vmem_limit_bytes=vmem_limit,
        ),
        cost_estimate=cost,
    )(patches, w_mat, b_mat)

    return out[:M, :E].reshape(B, N_p, E)


if __name__ == "__main__":
    # Small, deterministic example consistent with the module:
    # in_channels=4, emb_dim=32, patch_size=4, input 16x16 -> 16 patches.
    B, C, H, W = 2, 4, 16, 16
    emb_dim, patch_size = 32, 4

    key = jax.random.PRNGKey(0)
    kx, kw, kb = jax.random.split(key, 3)

    x = jax.random.normal(kx, (B, C, H, W), dtype=jnp.float32)
    # Deterministic Conv2d-shaped parameters: weight [E, C, p, p], bias [E].
    fan_in = C * patch_size * patch_size
    bound = 1.0 / (fan_in ** 0.5)
    weight = jax.random.uniform(
        kw, (emb_dim, C, patch_size, patch_size),
        minval=-bound, maxval=bound, dtype=jnp.float32)
    bias = jax.random.uniform(
        kb, (emb_dim,), minval=-bound, maxval=bound, dtype=jnp.float32)

    out = patch_embedding(x, weight, bias, patch_size)
    out = jax.block_until_ready(out)

    # f32 reference (conv-as-matmul). The kernel uses bf16 operands with f32
    # accumulation, so compare with a bf16-appropriate tolerance.
    H_p, W_p = H // patch_size, W // patch_size
    ref_patches = x.reshape(B, C, H_p, patch_size, W_p, patch_size)
    ref_patches = jnp.transpose(ref_patches, (0, 2, 4, 1, 3, 5)).reshape(
        B, H_p * W_p, -1)
    ref = jnp.einsum(
        "bnk,ek->bne", ref_patches, weight.reshape(emb_dim, -1),
        precision=jax.lax.Precision.HIGHEST) + bias[None, None, :]
    assert out.shape == (B, H_p * W_p, emb_dim)
    assert jnp.allclose(out, ref, atol=3e-2, rtol=3e-2), float(
        jnp.max(jnp.abs(out - ref)))

    print("KERNEL_OK")
</pallas_src>

<mosaic_0001>
module attributes {stable_mosaic.version = 11 : i64} {
  func.func @_patch_embed_kernel(%arg0: i32, %arg1: i32, %arg2: memref<32x128xbf16, #tpu.memory_space<vmem>>, %arg3: memref<128x128xbf16, #tpu.memory_space<vmem>>, %arg4: memref<1x128xf32, #tpu.memory_space<vmem>>, %arg5: memref<32x128xf32, #tpu.memory_space<vmem>>) attributes {dimension_semantics = [#tpu.dimension_semantics<parallel>, #tpu.dimension_semantics<parallel>], iteration_bounds = array<i64: 1, 1>, scalar_prefetch = 0 : i64, scratch_operands = 0 : i64, tpu.core_type = #tpu.core_type<tc>, window_params = [{transform_indices = @transform_0, window_bounds = array<i64: 32, 128>}, {transform_indices = @transform_1, window_bounds = array<i64: 128, 128>}, {transform_indices = @transform_2, window_bounds = array<i64: 1, 128>}, {transform_indices = @transform_3, window_bounds = array<i64: 32, 128>}]} {
    %c0 = arith.constant 0 : index
    %c0_0 = arith.constant 0 : index
    %0 = vector.load %arg2[%c0, %c0_0] : memref<32x128xbf16, #tpu.memory_space<vmem>>, vector<32x128xbf16>
    %c0_1 = arith.constant 0 : index
    %c0_2 = arith.constant 0 : index
    %1 = vector.load %arg3[%c0_1, %c0_2] : memref<128x128xbf16, #tpu.memory_space<vmem>>, vector<128x128xbf16>
    %cst = arith.constant dense<0.000000e+00> : vector<32x128xf32>
    %2 = tpu.matmul %0, %1, %cst {dimension_numbers = #tpu.dot_dimension_numbers<[1], [0], [0], [1], [0, 0, 1, 1], [], []>} : vector<32x128xbf16>, vector<128x128xbf16>, vector<32x128xf32> -> vector<32x128xf32>
    %c0_3 = arith.constant 0 : index
    %c0_4 = arith.constant 0 : index
    %3 = vector.load %arg4[%c0_3, %c0_4] : memref<1x128xf32, #tpu.memory_space<vmem>>, vector<1x128xf32>
    %4 = vector.broadcast %3 : vector<1x128xf32> to vector<32x128xf32>
    %5 = arith.addf %2, %4 : vector<32x128xf32>
    %c0_5 = arith.constant 0 : index
    %c0_6 = arith.constant 0 : index
    %6 = vector.load %arg5[%c0_5, %c0_6] : memref<32x128xf32, #tpu.memory_space<vmem>>, vector<32x128xf32>
    tpu.vector_store %arg5[%c0_5, %c0_6], %5 {strides = array<i32>} : memref<32x128xf32, #tpu.memory_space<vmem>>, vector<32x128xf32>,
    return
  }
  func.func @transform_0(%arg0: i32, %arg1: i32) -> (i32, i32) {
    %c0_i32 = arith.constant 0 : i32
    %c0_i32_0 = arith.constant 0 : i32
    return %arg0, %c0_i32 : i32, i32
  }
  func.func @transform_1(%arg0: i32, %arg1: i32) -> (i32, i32) {
    %c0_i32 = arith.constant 0 : i32
    %c0_i32_0 = arith.constant 0 : i32
    return %c0_i32, %arg1 : i32, i32
  }
  func.func @transform_2(%arg0: i32, %arg1: i32) -> (i32, i32) {
    %c0_i32 = arith.constant 0 : i32
    %c0_i32_0 = arith.constant 0 : i32
    return %c0_i32, %arg1 : i32, i32
  }
  func.func @transform_3(%arg0: i32, %arg1: i32) -> (i32, i32) {
    %c0_i32 = arith.constant 0 : i32
    return %arg0, %arg1 : i32, i32
  }
}

</mosaic_0001>

<bundles_post_ra>
// kernel: patch_embedding.1
= control target key start
LH: loop header
LB: loop body
LE: loop exit
PB: predicated region body
PF: predicated region fallthrough
CT: control target
= control target key end

     0   :  { %s287_s0 = inlined_call_operand.vmem [shape: bf16[32,128], index: 0, kind: input, shape index: {}]   ;;  %s288_s1 = inlined_call_operand.vmem [shape: bf16[128,128], index: 1, kind: input, shape index: {}]   ;;  %s289_s2 = inlined_call_operand.vmem [shape: f32[1,128], index: 2, kind: input, shape index: {}]   ;;  %s290_s3 = inlined_call_operand.hbm [shape: f32[32,128], index: 3, kind: output, shape index: {}]  }
   0x1   :  { %v189_v0 = vld [vmem:[%s288_s1 + $0x38] sm:$0xff]  ;;  %v188_v1 = vld [vmem:[%s288_s1 + $0x30] sm:$0xff] }
   0x2   :  { %99 = vmatpush.bf16.msra.mxu0 %v189_v0  ;;  %190 = vmatpush.bf16.msra.mxu1 %v189_v0 }
   0x3   :  { %8 = vsyncpa [#allocation3], 0  ;;  %v187_v2 = vld [vmem:[%s288_s1 + $0x28] sm:$0xff]  ;;  %v186_v3 = vld [vmem:[%s288_s1 + $0x20] sm:$0xff]  ;;  %s230_s10 = smov 8  }
   0x4   :  { %v185_v4 = vld [vmem:[%s288_s1 + $0x18] sm:$0xff]  ;;  %v184_v5 = vld [vmem:[%s288_s1 + $0x10] sm:$0xff]  ;;  %v183_v6 = vld [vmem:[%s288_s1 + $0x8] sm:$0xff] }
   0x5   :  { %v182_v7 = vld [vmem:[%s288_s1] sm:$0xff]  ;;  %v181_v9 = vld [vmem:[%s287_s0 + $0x8] sm:$0xff]  ;;  %s228_s1 = smov [#allocation2]  }
   0x6   :  { %100 = vmatpush.bf16.msra.mxu0 %v188_v1  ;;  %191 = vmatpush.bf16.msra.mxu1 %v188_v1  ;;  %v180_v8 = vld [vmem:[%s287_s0] sm:$0xff]  ;;  %s126_s7 = sshll.u32 %s228_s1, 4  ;;  %s128_s0 = sshll.u32 %s290_s3, 4  ;;  %s127_s7 = int_to_ptr.vmem [resolvable:$true] %s126_s7  ;;  %s129_s0 = int_to_ptr.hbm [resolvable:$true] %s128_s0 }
   0x7   :  { %v201_v10 = vld [vmem:[%s289_s2] ss:$0 sm:$0xff]  ;;  %s229_s2 = smov 128  }
   0xa   :  { %101 = vmatpush.bf16.msra.mxu0 %v187_v2  ;;  %192 = vmatpush.bf16.msra.mxu1 %v187_v2 }
   0xe   :  { %102 = vmatpush.bf16.msra.mxu0 %v186_v3  ;;  %193 = vmatpush.bf16.msra.mxu1 %v186_v3 }
  0x12   :  { %103 = vmatpush.bf16.msra.mxu0 %v185_v4  ;;  %194 = vmatpush.bf16.msra.mxu1 %v185_v4 }
  0x16   :  { %104 = vmatpush.bf16.msra.mxu0 %v184_v5  ;;  %195 = vmatpush.bf16.msra.mxu1 %v184_v5 }
  0x1a   :  { %105 = vmatpush.bf16.msra.mxu0 %v183_v6  ;;  %196 = vmatpush.bf16.msra.mxu1 %v183_v6 }
  0x1e   :  { %106 = vmatpush.bf16.msra.mxu0 %v182_v7  ;;  %197 = vmatpush.bf16.msra.mxu1 %v182_v7 }
  0x21   :  { %107 = vmatmul.bf16.vlgmr.msra.gmra.mxu0 %v180_v8  ;;  %112 = vmatmul.bf16.vlgmr.msra.gmra.mxu1 %v181_v9 }
  0x9e   :  { %v108_v11 = vpop.f32.mrf.mxu0  ;;  %v113_v12 = vpop.f32.mrf.mxu1 }
  0x9f   :  { %v109_v13 = vadd.f32 %v201_v10, %v108_v11  ;;  %v114_v14 = vadd.f32 %v201_v10, %v113_v12 }
  0xa1   :  { %118 = vst [vmem:[#allocation2] sm:$0xff] %v109_v13 }
  0xa2   :  { %120 = vst [vmem:[#allocation2 + $0x10] sm:$0xff] %v114_v14 }
  0xa6   :  { %v110_v15 = vpop.f32.mrf.mxu0  ;;  %v115_v16 = vpop.f32.mrf.mxu1 }
  0xa7   :  { %v111_v17 = vadd.f32 %v201_v10, %v110_v15  ;;  %v116_v18 = vadd.f32 %v201_v10, %v115_v16 }
  0xa9   :  { %119 = vst [vmem:[#allocation2 + $0x8] sm:$0xff] %v111_v17 }
  0xaa   :  { %121 = vst [vmem:[#allocation2 + $0x18] sm:$0xff] %v116_v18 }
  0xab   :  { %134 = dma.vmem_to_hbm [thread:$0]  %s127_s7, 512, %s129_s0, [#allocation3], %s229_s2, %s229_s2, %s230_s10  }
  0xac   :  { %226 = dma.done.wait [#allocation3], 512  }
  0xad   :  { %227 = vsyncadd [#allocation3], 4294966784 }
  0xae   :  { %139 = vsyncpa [#allocation3], 1 }

</bundles_post_ra>
